<compile_context>
chip_gen: v7x
topology: tpu7x:2x2x1
jax: 0.10.0
libtpu: 0.0.40
codegen_flags: <defaults>
</compile_context>

<pallas_src>
import jax
import jax.numpy as jnp
from jax.experimental import pallas as pl
from jax.experimental.pallas import tpu as pltpu


def _res_gate_kernel(m_ref, mt_ref, w1a_ref, w1b_ref, b1_ref,
                     w2a_ref, w2b_ref, b2_ref, y_ref):
    # m_ref, mt_ref : (TM, E)   activation tiles (native dtype)
    # w1a/w1b       : (E, 2E)   fc1 weight, split along input rows (resident)
    # b1            : (1, 2E)   f32
    # w2a/w2b       : (E, E)    fc2 weight, split along input rows (resident)
    # b2            : (1, E)    f32
    # y_ref         : (TM, E)
    E = m_ref.shape[-1]
    m = m_ref[...]
    mt = mt_ref[...]

    # fc1(concat(m, mt)) + bias, f32 accumulation on the MXU.
    x = (jnp.dot(m, w1a_ref[...], preferred_element_type=jnp.float32)
         + jnp.dot(mt, w1b_ref[...], preferred_element_type=jnp.float32)
         + b1_ref[...])
    z = jax.nn.sigmoid(x)

    # Gated multiply; split the gate back into its two halves so the concat is
    # never materialized. Cast back to the input dtype for the second matmul.
    ha = (z[:, :E] * m.astype(jnp.float32)).astype(m_ref.dtype)
    hb = (z[:, E:] * mt.astype(jnp.float32)).astype(mt_ref.dtype)

    y = (jnp.dot(ha, w2a_ref[...], preferred_element_type=jnp.float32)
         + jnp.dot(hb, w2b_ref[...], preferred_element_type=jnp.float32)
         + b2_ref[...])

    y_ref[...] = y.astype(y_ref.dtype)


def complex_res_gate(m, m_tild, w1, b1, w2, b2, *, tm=512):
    """m, m_tild: (B, S, E); w1: (2E, 2E); b1: (2E,); w2: (2E, E); b2: (E,)."""
    B, S, E = m.shape
    M = B * S
    two_e = 2 * E

    # Flatten rows; no feature-axis concat in HBM.
    m2 = m.reshape(M, E)
    mt2 = m_tild.reshape(M, E)

    # Static row-wise weight splits (free at trace time).
    w1a, w1b = w1[:E], w1[E:]
    w2a, w2b = w2[:E], w2[E:]
    b1_2d = b1.reshape(1, two_e).astype(jnp.float32)
    b2_2d = b2.reshape(1, E).astype(jnp.float32)

    # Row tile: biggest tile <= tm; a full-extent block is always legal, and
    # tm=512 is a multiple of 8/16 so tiled blocks satisfy the (8,128) rule.
    TM = M if M <= tm else tm
    grid = (pl.cdiv(M, TM),)

    act_bytes = jnp.dtype(m.dtype).itemsize
    w_bytes = jnp.dtype(w1.dtype).itemsize
    cost = pl.CostEstimate(
        flops=2 * M * two_e * two_e + 2 * M * two_e * E,
        transcendentals=M * two_e,
        bytes_accessed=(3 * M * E) * act_bytes
        + (two_e * two_e + two_e * E) * w_bytes
        + (two_e + E) * 4,
    )

    y_flat = pl.pallas_call(
        _res_gate_kernel,
        out_shape=jax.ShapeDtypeStruct((M, E), m.dtype),
        grid_spec=pltpu.PrefetchScalarGridSpec(
            num_scalar_prefetch=0,
            grid=grid,
            in_specs=[
                pl.BlockSpec((TM, E), lambda i: (i, 0)),       # m tile
                pl.BlockSpec((TM, E), lambda i: (i, 0)),       # m_tild tile
                pl.BlockSpec((E, two_e), lambda i: (0, 0)),    # w1[:E]  resident
                pl.BlockSpec((E, two_e), lambda i: (0, 0)),    # w1[E:]  resident
                pl.BlockSpec((1, two_e), lambda i: (0, 0)),    # b1      resident
                pl.BlockSpec((E, E), lambda i: (0, 0)),        # w2[:E]  resident
                pl.BlockSpec((E, E), lambda i: (0, 0)),        # w2[E:]  resident
                pl.BlockSpec((1, E), lambda i: (0, 0)),        # b2      resident
            ],
            out_specs=pl.BlockSpec((TM, E), lambda i: (i, 0)),
        ),
        compiler_params=pltpu.CompilerParams(
            dimension_semantics=("parallel",)),
        cost_estimate=cost,
    )(m2, mt2, w1a, w1b, b1_2d, w2a, w2b, b2_2d)

    return y_flat.reshape(B, S, E)


def _reference(m, m_tild, w1, b1, w2, b2):
    mcat = jnp.concatenate([m, m_tild], axis=2)
    x = mcat @ w1 + b1
    z = jax.nn.sigmoid(x)
    return (z * mcat) @ w2 + b2


if __name__ == "__main__":
    B, S, E = 2, 8, 32
    key = jax.random.PRNGKey(0)
    k_m, k_mt, k_w1, k_b1, k_w2, k_b2 = jax.random.split(key, 6)

    m = jax.random.normal(k_m, (B, S, E), dtype=jnp.float32)
    m_tild = jax.random.normal(k_mt, (B, S, E), dtype=jnp.float32)

    # Deterministic parameter init (uniform, like nn.Linear default scale).
    fan1 = 2 * E
    w1 = jax.random.uniform(k_w1, (2 * E, 2 * E), dtype=jnp.float32,
                            minval=-1.0, maxval=1.0) / jnp.sqrt(fan1)
    b1 = jax.random.uniform(k_b1, (2 * E,), dtype=jnp.float32,
                            minval=-1.0, maxval=1.0) / jnp.sqrt(fan1)
    w2 = jax.random.uniform(k_w2, (2 * E, E), dtype=jnp.float32,
                            minval=-1.0, maxval=1.0) / jnp.sqrt(fan1)
    b2 = jax.random.uniform(k_b2, (E,), dtype=jnp.float32,
                            minval=-1.0, maxval=1.0) / jnp.sqrt(fan1)

    y = complex_res_gate(m, m_tild, w1, b1, w2, b2)
    jax.block_until_ready(y)

    y_ref = _reference(m, m_tild, w1, b1, w2, b2)
    assert y.shape == (B, S, E)
    assert jnp.allclose(y, y_ref, atol=1e-5, rtol=1e-5)

    print("KERNEL_OK")
</pallas_src>

<mosaic_0001>
module attributes {stable_mosaic.version = 11 : i64} {
  func.func @_res_gate_kernel(%arg0: i32, %arg1: memref<16x32xf32, #tpu.memory_space<vmem>>, %arg2: memref<16x32xf32, #tpu.memory_space<vmem>>, %arg3: memref<32x64xf32, #tpu.memory_space<vmem>>, %arg4: memref<32x64xf32, #tpu.memory_space<vmem>>, %arg5: memref<1x64xf32, #tpu.memory_space<vmem>>, %arg6: memref<32x32xf32, #tpu.memory_space<vmem>>, %arg7: memref<32x32xf32, #tpu.memory_space<vmem>>, %arg8: memref<1x32xf32, #tpu.memory_space<vmem>>, %arg9: memref<16x32xf32, #tpu.memory_space<vmem>>) attributes {dimension_semantics = [#tpu.dimension_semantics<parallel>], iteration_bounds = array<i64: 1>, scalar_prefetch = 0 : i64, scratch_operands = 0 : i64, tpu.core_type = #tpu.core_type<tc>, window_params = [{transform_indices = @transform_0, window_bounds = array<i64: 16, 32>}, {transform_indices = @transform_1, window_bounds = array<i64: 16, 32>}, {pipeline_mode = #tpu.pipeline_mode<synchronous>, transform_indices = @transform_2, window_bounds = array<i64: 32, 64>}, {pipeline_mode = #tpu.pipeline_mode<synchronous>, transform_indices = @transform_3, window_bounds = array<i64: 32, 64>}, {pipeline_mode = #tpu.pipeline_mode<synchronous>, transform_indices = @transform_4, window_bounds = array<i64: 1, 64>}, {pipeline_mode = #tpu.pipeline_mode<synchronous>, transform_indices = @transform_5, window_bounds = array<i64: 32, 32>}, {pipeline_mode = #tpu.pipeline_mode<synchronous>, transform_indices = @transform_6, window_bounds = array<i64: 32, 32>}, {pipeline_mode = #tpu.pipeline_mode<synchronous>, transform_indices = @transform_7, window_bounds = array<i64: 1, 32>}, {transform_indices = @transform_8, window_bounds = array<i64: 16, 32>}]} {
    %c0 = arith.constant 0 : index
    %c0_0 = arith.constant 0 : index
    %0 = vector.load %arg1[%c0, %c0_0] : memref<16x32xf32, #tpu.memory_space<vmem>>, vector<16x32xf32>
    %c0_1 = arith.constant 0 : index
    %c0_2 = arith.constant 0 : index
    %1 = vector.load %arg2[%c0_1, %c0_2] : memref<16x32xf32, #tpu.memory_space<vmem>>, vector<16x32xf32>
    %c0_3 = arith.constant 0 : index
    %c0_4 = arith.constant 0 : index
    %2 = vector.load %arg3[%c0_3, %c0_4] : memref<32x64xf32, #tpu.memory_space<vmem>>, vector<32x64xf32>
    %cst = arith.constant dense<0.000000e+00> : vector<16x64xf32>
    %3 = tpu.matmul %0, %2, %cst {dimension_numbers = #tpu.dot_dimension_numbers<[1], [0], [0], [1], [0, 0, 1, 1], [], []>} : vector<16x32xf32>, vector<32x64xf32>, vector<16x64xf32> -> vector<16x64xf32>
    %c0_5 = arith.constant 0 : index
    %c0_6 = arith.constant 0 : index
    %4 = vector.load %arg4[%c0_5, %c0_6] : memref<32x64xf32, #tpu.memory_space<vmem>>, vector<32x64xf32>
    %cst_7 = arith.constant dense<0.000000e+00> : vector<16x64xf32>
    %5 = tpu.matmul %1, %4, %cst_7 {dimension_numbers = #tpu.dot_dimension_numbers<[1], [0], [0], [1], [0, 0, 1, 1], [], []>} : vector<16x32xf32>, vector<32x64xf32>, vector<16x64xf32> -> vector<16x64xf32>
    %6 = arith.addf %3, %5 : vector<16x64xf32>
    %c0_8 = arith.constant 0 : index
    %c0_9 = arith.constant 0 : index
    %7 = vector.load %arg5[%c0_8, %c0_9] : memref<1x64xf32, #tpu.memory_space<vmem>>, vector<1x64xf32>
    %8 = vector.broadcast %7 : vector<1x64xf32> to vector<16x64xf32>
    %9 = arith.addf %6, %8 : vector<16x64xf32>
    %10 = arith.negf %9 : vector<16x64xf32>
    %11 = math.exp %10 : vector<16x64xf32>
    %cst_10 = arith.constant 1.000000e+00 : f32
    %12 = vector.broadcast %cst_10 : f32 to vector<16x64xf32>
    %13 = arith.addf %12, %11 : vector<16x64xf32>
    %14 = arith.divf %12, %13 : vector<16x64xf32>
    %15 = vector.extract_strided_slice %14 {offsets = [0, 0], sizes = [16, 32], strides = [1, 1]} : vector<16x64xf32> to vector<16x32xf32>
    %16 = arith.mulf %15, %0 : vector<16x32xf32>
    %17 = vector.extract_strided_slice %14 {offsets = [0, 32], sizes = [16, 32], strides = [1, 1]} : vector<16x64xf32> to vector<16x32xf32>
    %18 = arith.mulf %17, %1 : vector<16x32xf32>
    %c0_11 = arith.constant 0 : index
    %c0_12 = arith.constant 0 : index
    %19 = vector.load %arg6[%c0_11, %c0_12] : memref<32x32xf32, #tpu.memory_space<vmem>>, vector<32x32xf32>
    %cst_13 = arith.constant dense<0.000000e+00> : vector<16x32xf32>
    %20 = tpu.matmul %16, %19, %cst_13 {dimension_numbers = #tpu.dot_dimension_numbers<[1], [0], [0], [1], [0, 0, 1, 1], [], []>} : vector<16x32xf32>, vector<32x32xf32>, vector<16x32xf32> -> vector<16x32xf32>
    %c0_14 = arith.constant 0 : index
    %c0_15 = arith.constant 0 : index
    %21 = vector.load %arg7[%c0_14, %c0_15] : memref<32x32xf32, #tpu.memory_space<vmem>>, vector<32x32xf32>
    %cst_16 = arith.constant dense<0.000000e+00> : vector<16x32xf32>
    %22 = tpu.matmul %18, %21, %cst_16 {dimension_numbers = #tpu.dot_dimension_numbers<[1], [0], [0], [1], [0, 0, 1, 1], [], []>} : vector<16x32xf32>, vector<32x32xf32>, vector<16x32xf32> -> vector<16x32xf32>
    %23 = arith.addf %20, %22 : vector<16x32xf32>
    %c0_17 = arith.constant 0 : index
    %c0_18 = arith.constant 0 : index
    %24 = vector.load %arg8[%c0_17, %c0_18] : memref<1x32xf32, #tpu.memory_space<vmem>>, vector<1x32xf32>
    %25 = vector.broadcast %24 : vector<1x32xf32> to vector<16x32xf32>
    %26 = arith.addf %23, %25 : vector<16x32xf32>
    %c0_19 = arith.constant 0 : index
    %c0_20 = arith.constant 0 : index
    %27 = vector.load %arg9[%c0_19, %c0_20] : memref<16x32xf32, #tpu.memory_space<vmem>>, vector<16x32xf32>
    tpu.vector_store %arg9[%c0_19, %c0_20], %26 {strides = array<i32>} : memref<16x32xf32, #tpu.memory_space<vmem>>, vector<16x32xf32>,
    return
  }
  func.func @transform_0(%arg0: i32) -> (i32, i32) {
    %c0_i32 = arith.constant 0 : i32
    %c0_i32_0 = arith.constant 0 : i32
    return %arg0, %c0_i32 : i32, i32
  }
  func.func @transform_1(%arg0: i32) -> (i32, i32) {
    %c0_i32 = arith.constant 0 : i32
    %c0_i32_0 = arith.constant 0 : i32
    return %arg0, %c0_i32 : i32, i32
  }
  func.func @transform_2(%arg0: i32) -> (i32, i32) {
    %c0_i32 = arith.constant 0 : i32
    %c0_i32_0 = arith.constant 0 : i32
    %c0_i32_1 = arith.constant 0 : i32
    return %c0_i32, %c0_i32_0 : i32, i32
  }
  func.func @transform_3(%arg0: i32) -> (i32, i32) {
    %c0_i32 = arith.constant 0 : i32
    %c0_i32_0 = arith.constant 0 : i32
    %c0_i32_1 = arith.constant 0 : i32
    return %c0_i32, %c0_i32_0 : i32, i32
  }
  func.func @transform_4(%arg0: i32) -> (i32, i32) {
    %c0_i32 = arith.constant 0 : i32
    %c0_i32_0 = arith.constant 0 : i32
    %c0_i32_1 = arith.constant 0 : i32
    return %c0_i32, %c0_i32_0 : i32, i32
  }
  func.func @transform_5(%arg0: i32) -> (i32, i32) {
    %c0_i32 = arith.constant 0 : i32
    %c0_i32_0 = arith.constant 0 : i32
    %c0_i32_1 = arith.constant 0 : i32
    return %c0_i32, %c0_i32_0 : i32, i32
  }
  func.func @transform_6(%arg0: i32) -> (i32, i32) {
    %c0_i32 = arith.constant 0 : i32
    %c0_i32_0 = arith.constant 0 : i32
    %c0_i32_1 = arith.constant 0 : i32
    return %c0_i32, %c0_i32_0 : i32, i32
  }
  func.func @transform_7(%arg0: i32) -> (i32, i32) {
    %c0_i32 = arith.constant 0 : i32
    %c0_i32_0 = arith.constant 0 : i32
    %c0_i32_1 = arith.constant 0 : i32
    return %c0_i32, %c0_i32_0 : i32, i32
  }
  func.func @transform_8(%arg0: i32) -> (i32, i32) {
    %c0_i32 = arith.constant 0 : i32
    %c0_i32_0 = arith.constant 0 : i32
    return %arg0, %c0_i32 : i32, i32
  }
}

</mosaic_0001>

<bundles_post_ra>
// kernel: tpu_custom_call.1
= control target key start
LH: loop header
LB: loop body
LE: loop exit
PB: predicated region body
PF: predicated region fallthrough
CT: control target
= control target key end

     0   :  { %13 = vsyncpa [#allocation3], 0  ;;  %s1020_s0 = inlined_call_operand.hbm [shape: f32[16,32], index: 0, kind: input, shape index: {}]   ;;  %s1021_s1 = inlined_call_operand.hbm [shape: f32[16,32], index: 1, kind: input, shape index: {}]   ;;  %s1022_s2 = inlined_call_operand.hbm [shape: f32[32,64], index: 2, kind: input, shape index: {}]   ;;  %s1023_s3 = inlined_call_operand.hbm [shape: f32[32,64], index: 3, kind: input, shape index: {}]   ;;  %s1024_s4 = inlined_call_operand.vmem [shape: f32[1,64], index: 4, kind: input, shape index: {}]   ;;  %s1025_s5 = inlined_call_operand.hbm [shape: f32[32,32], index: 5, kind: input, shape index: {}]   ;;  %s1026_s6 = inlined_call_operand.hbm [shape: f32[32,32], index: 6, kind: input, shape index: {}]   ;;  %s1027_s7 = inlined_call_operand.vmem [shape: f32[1,32], index: 7, kind: input, shape index: {}]   ;;  %s1028_s8 = inlined_call_operand.hbm [shape: f32[16,32], index: 8, kind: output, shape index: {}]  }
   0x1   :  { %14 = vsyncpa [#allocation6], 0 }
   0x2   :  { %15 = vsyncpa [#allocation9], 0 }
   0x3   :  { %16 = vsyncpa [#allocation12], 0 }
   0x4   :  { %17 = vsyncpa [#allocation4], 0  ;;  %s822_s27 = smov [#allocation5]   ;;  %s823_s29 = smov [#allocation8]  }
   0x5   :  { %s35_s28 = sshll.u32 %s822_s27, 4  ;;  %s59_s30 = sshll.u32 %s823_s29, 4  ;;  %s36_s28 = int_to_ptr.vmem [resolvable:$true] %s35_s28  ;;  %s878_s30 = int_to_ptr.vmem [resolvable:$true] %s59_s30 }
   0x6   :  { %s658_s11 = scalar_lea.hbm %s1021_s1, 256 }
   0x7   :  { %p659_p0 = scmp.ne.s32.totalorder %s1021_s1, %s658_s11  ;;  %p662_p1 = scmp.lt.u32.totalorder %s658_s11, %s1021_s1 }
   0x9   :  { %p664_p2 = pnand %p662_p1, %p659_p0 }
   0xb   :  { %667 = shalt.err (!%p664_p2)
}
   0xc   :  { %s668_s16 = scalar_lea.vmem %s36_s28, 256  ;;  %p673_p4 = scmp.lt.s32.totalorder %s36_s28, %s36_s28 }
   0xd   :  { %p669_p3 = scmp.ne.s32.totalorder %s36_s28, %s668_s16  ;;  %p674_p5 = scmp.lt.s32.totalorder %s668_s16, %s668_s16 }
   0xf   :  { %p675_p6 = por %p674_p5, %p673_p4 }
  0x11   :  { %p676_p7 = pnand %p675_p6, %p669_p3 }
  0x13   :  { %679 = shalt.err (!%p676_p7)
}
  0x14   :  { %s824_s17 = smov 128   ;;  %s825_s18 = smov 8  }
  0x15   :  { %41 = dma.hbm_to_vmem [thread:$0]  %s1021_s1, 256, %s36_s28, [#allocation6], %s824_s17, %s824_s17, %s825_s18  }
  0x16   :  { %s680_s23 = scalar_lea.hbm %s1023_s3, 512 }
  0x17   :  { %p681_p8 = scmp.ne.s32.totalorder %s1023_s3, %s680_s23  ;;  %p684_p9 = scmp.lt.u32.totalorder %s680_s23, %s1023_s3 }
  0x19   :  { %p686_p10 = pnand %p684_p9, %p681_p8 }
  0x1b   :  { %689 = shalt.err (!%p686_p10)
}
  0x1c   :  { %s690_s29 = scalar_lea.vmem %s878_s30, 512  ;;  %p695_p12 = scmp.lt.s32.totalorder %s878_s30, %s878_s30 }
  0x1d   :  { %p691_p11 = scmp.ne.s32.totalorder %s878_s30, %s690_s29  ;;  %p696_p13 = scmp.lt.s32.totalorder %s690_s29, %s690_s29 }
  0x1f   :  { %p697_p0 = por %p696_p13, %p695_p12 }
  0x21   :  { %p698_p1 = pnand %p697_p0, %p691_p11 }
  0x23   :  { %701 = shalt.err (!%p698_p1)
}
  0x24   :  { %65 = dma.hbm_to_vmem [thread:$0]  %s1023_s3, 512, %s878_s30, [#allocation9], %s824_s17, %s824_s17, %s825_s18  }
  0x25   :  { %s826_s9 = smov [#allocation2]   ;;  %s827_s11 = smov [#allocation7]  }
  0x26   :  { %s23_s10 = sshll.u32 %s826_s9, 4  ;;  %s47_s12 = sshll.u32 %s827_s11, 4  ;;  %s24_s10 = int_to_ptr.vmem [resolvable:$true] %s23_s10  ;;  %s915_s12 = int_to_ptr.vmem [resolvable:$true] %s47_s12 }
  0x27   :  { %s702_s15 = scalar_lea.hbm %s1020_s0, 256 }
  0x28   :  { %p703_p2 = scmp.ne.s32.totalorder %s1020_s0, %s702_s15  ;;  %p706_p3 = scmp.lt.u32.totalorder %s702_s15, %s1020_s0 }
  0x2a   :  { %p708_p4 = pnand %p706_p3, %p703_p2 }
  0x2c   :  { %711 = shalt.err (!%p708_p4)
}
  0x2d   :  { %s712_s3 = scalar_lea.vmem %s24_s10, 256  ;;  %p717_p6 = scmp.lt.s32.totalorder %s24_s10, %s24_s10 }
  0x2e   :  { %p713_p5 = scmp.ne.s32.totalorder %s24_s10, %s712_s3  ;;  %p718_p7 = scmp.lt.s32.totalorder %s712_s3, %s712_s3 }
  0x30   :  { %p719_p8 = por %p718_p7, %p717_p6 }
  0x32   :  { %p720_p9 = pnand %p719_p8, %p713_p5 }
  0x34   :  { %723 = shalt.err (!%p720_p9)
}
  0x35   :  { %29 = dma.hbm_to_vmem [thread:$0]  %s1020_s0, 256, %s24_s10, [#allocation3], %s824_s17, %s824_s17, %s825_s18  }
  0x36   :  { %s724_s25 = scalar_lea.hbm %s1022_s2, 512 }
  0x37   :  { %p725_p10 = scmp.ne.s32.totalorder %s1022_s2, %s724_s25  ;;  %p728_p11 = scmp.lt.u32.totalorder %s724_s25, %s1022_s2 }
  0x39   :  { %p730_p12 = pnand %p728_p11, %p725_p10 }
  0x3b   :  { %733 = shalt.err (!%p730_p12)
}
  0x3c   :  { %s734_s28 = scalar_lea.vmem %s915_s12, 512  ;;  %p739_p0 = scmp.lt.s32.totalorder %s915_s12, %s915_s12 }
  0x3d   :  { %p735_p13 = scmp.ne.s32.totalorder %s915_s12, %s734_s28  ;;  %p740_p1 = scmp.lt.s32.totalorder %s734_s28, %s734_s28 }
  0x3f   :  { %p741_p2 = por %p740_p1, %p739_p0 }
  0x41   :  { %p742_p3 = pnand %p741_p2, %p735_p13 }
  0x43   :  { %745 = shalt.err (!%p742_p3)
}
  0x44   :  { %53 = dma.hbm_to_vmem [thread:$0]  %s1022_s2, 512, %s915_s12, [#allocation6], %s824_s17, %s824_s17, %s825_s18  }
  0x45   :  { %s828_s10 = smov [#allocation10]   ;;  %s829_s13 = smov [#allocation11]  }
  0x46   :  { %s73_s11 = sshll.u32 %s828_s10, 4  ;;  %s85_s14 = sshll.u32 %s829_s13, 4  ;;  %s74_s11 = int_to_ptr.vmem [resolvable:$true] %s73_s11  ;;  %s952_s14 = int_to_ptr.vmem [resolvable:$true] %s85_s14 }
  0x47   :  { %s746_s19 = scalar_lea.hbm %s1025_s5, 512 }
  0x48   :  { %p747_p4 = scmp.ne.s32.totalorder %s1025_s5, %s746_s19  ;;  %p750_p5 = scmp.lt.u32.totalorder %s746_s19, %s1025_s5 }
  0x4a   :  { %p752_p6 = pnand %p750_p5, %p747_p4 }
  0x4c   :  { %755 = shalt.err (!%p752_p6)
}
  0x4d   :  { %s756_s2 = scalar_lea.vmem %s74_s11, 512  ;;  %p761_p8 = scmp.lt.s32.totalorder %s74_s11, %s74_s11 }
  0x4e   :  { %p757_p7 = scmp.ne.s32.totalorder %s74_s11, %s756_s2  ;;  %p762_p9 = scmp.lt.s32.totalorder %s756_s2, %s756_s2 }
  0x50   :  { %p763_p10 = por %p762_p9, %p761_p8 }
  0x52   :  { %p764_p11 = pnand %p763_p10, %p757_p7 }
  0x54   :  { %767 = shalt.err (!%p764_p11)
}
  0x55   :  { %79 = dma.hbm_to_vmem [thread:$0]  %s1025_s5, 512, %s74_s11, [#allocation9], %s824_s17, %s824_s17, %s825_s18  }
  0x56   :  { %s768_s25 = scalar_lea.hbm %s1026_s6, 512 }
  0x57   :  { %p769_p12 = scmp.ne.s32.totalorder %s1026_s6, %s768_s25  ;;  %p772_p13 = scmp.lt.u32.totalorder %s768_s25, %s1026_s6 }
  0x59   :  { %p774_p0 = pnand %p772_p13, %p769_p12 }
  0x5b   :  { %777 = shalt.err (!%p774_p0)
}
  0x5c   :  { %s778_s28 = scalar_lea.vmem %s952_s14, 512  ;;  %p783_p2 = scmp.lt.s32.totalorder %s952_s14, %s952_s14 }
  0x5d   :  { %p779_p1 = scmp.ne.s32.totalorder %s952_s14, %s778_s28  ;;  %p784_p3 = scmp.lt.s32.totalorder %s778_s28, %s778_s28 }
  0x5f   :  { %p785_p4 = por %p784_p3, %p783_p2 }
  0x61   :  { %p786_p5 = pnand %p785_p4, %p779_p1 }
  0x63   :  { %789 = shalt.err (!%p786_p5)
}
  0x64   :  { %91 = dma.hbm_to_vmem [thread:$0]  %s1026_s6, 512, %s952_s14, [#allocation12], %s824_s17, %s824_s17, %s825_s18  }
  0x65   :  { %812 = dma.done.wait [#allocation3], 256  }
  0x66   :  { %813 = vsyncadd [#allocation3], 4294967040 }
  0x67   :  { %814 = dma.done.wait [#allocation6], 768  }
  0x68   :  { %815 = vsyncadd [#allocation6], 4294966528 }
  0x69   :  { %816 = dma.done.wait [#allocation9], 1024  }
  0x6a   :  { %817 = vsyncadd [#allocation9], 4294966272 }
  0x6b   :  { %818 = dma.done.wait [#allocation12], 512  }
  0x6c   :  { %819 = vsyncadd [#allocation12], 4294966784  ;;  %vm124_vm0 = vcmask 261120   ;;  %v120_v0 = vld [vmem:[#allocation8] sm:$0xff]  ;;  %v121_v1 = vld [vmem:[#allocation8 + $0x8] sm:$0xff]  ;;  %s830_s6 = smov 32  }
  0x6d   :  { %v122_v2 = vld [vmem:[#allocation8 + $0x10] sm:$0xff]  ;;  %v603_v3 = vpack.c.bf16 %v121_v1, %v120_v0  ;;  %v123_v4 = vld [vmem:[#allocation8 + $0x18] sm:$0xff]  ;;  %v116_v7 = vld [vmem:[#allocation7] sm:$0xff]  ;;  %s832_s14 = smov [#allocation13]  }
  0x6e   :  { %v114_v5 = vld [vmem:[#allocation5] sm:$0xff]  ;;  %v607_v6 = vpack.c.bf16 %v123_v4, %v122_v2  ;;  %v117_v8 = vld [vmem:[#allocation7 + $0x8] sm:$0xff]  ;;  %v115_v9 = vld [vmem:[#allocation5 + $0x8] sm:$0xff]  ;;  %s508_s15 = sshll.u32 %s832_s14, 4  ;;  %s509_s15 = int_to_ptr.vmem [resolvable:$true] %s508_s15 }
  0x6f   :  { %567 = vmatprep.mubr.msk.f32.mxu0 %vm124_vm0, %v114_v5  ;;  %310 = vrot.lane.b32.xlu0 %v114_v5, %s830_s6  ;;  %v611_v10 = vpack.c.bf16 %v117_v8, %v116_v7  ;;  %v118_v11 = vld [vmem:[#allocation7 + $0x10] sm:$0xff]  ;;  %v119_v12 = vld [vmem:[#allocation7 + $0x18] sm:$0xff]  ;;  %v112_v14 = vld [vmem:[#allocation2] sm:$0xff]  ;;  %s790_s16 = scalar_lea.vmem %s509_s15, 256  ;;  %p795_p7 = scmp.lt.s32.totalorder %s509_s15, %s509_s15 }
  0x70   :  { %604 = vmatprep.subr.bf16.mxu0 %v603_v3  ;;  %v615_v13 = vpack.c.bf16 %v119_v12, %v118_v11  ;;  %v113_v15 = vld [vmem:[#allocation2 + $0x8] sm:$0xff]  ;;  %v322_v16 = vld [vmem:[#allocation11] sm:$0xff]  ;;  %v324_v28 = vld [vmem:[#allocation11 + $0x10] sm:$0xff]  ;;  %p791_p6 = scmp.ne.s32.totalorder %s509_s15, %s790_s16  ;;  %p796_p8 = scmp.lt.s32.totalorder %s790_s16, %s790_s16 }
  0x71   :  { %606 = vmatpush3.bf16.msra.mxu0 %v603_v3  ;;  %v323_v17 = vld [vmem:[#allocation11 + $0x8] sm:$0xff]  ;;  %v527_v19 = vld [vmem:[%s1024_s4] ss:$0 sm:$0xff]  ;;  %v325_v29 = vld [vmem:[#allocation11 + $0x18] sm:$0xff]  ;;  %s831_s4 = smov 96  }
  0x72   :  { %608 = vmatprep.subr.bf16.mxu0 %v607_v6  ;;  %v619_v18 = vpack.c.bf16 %v323_v17, %v322_v16  ;;  %v623_v32 = vpack.c.bf16 %v325_v29, %v324_v28  ;;  %v318_v33 = vld [vmem:[#allocation10] sm:$0xff]  ;;  %v319_v34 = vld [vmem:[#allocation10 + $0x8] sm:$0xff]  ;;  %v320_v43 = vld [vmem:[#allocation10 + $0x10] sm:$0xff]  ;;  %p797_p9 = por %p796_p8, %p795_p7 }
  0x73   :  { %312 = vrot.lane.b32.xlu0 %v115_v9, %s830_s6  ;;  %v627_v35 = vpack.c.bf16 %v319_v34, %v318_v33  ;;  %v321_v44 = vld [vmem:[#allocation10 + $0x18] sm:$0xff]  ;;  %v534_v49 = vld [vmem:[%s1027_s7] ss:$0 sm:$0xff] }
  0x74   :  { %620 = vmatprep.subr.bf16.mxu1 %v619_v18  ;;  %v631_v45 = vpack.c.bf16 %v321_v44, %v320_v43  ;;  %p798_p10 = pnand %p797_p9, %p791_p6 }
  0x75   :  { %610 = vmatpush3.bf16.msra.mxu0 %v607_v6  ;;  %622 = vmatpush3.bf16.msra.mxu1 %v619_v18 }
  0x76   :  { %612 = vmatprep.subr.bf16.mxu0 %v611_v10  ;;  %624 = vmatprep.subr.bf16.mxu1 %v623_v32 }
  0x78   :  { %568 = vmatmul.mubr.msk.f32.vlgmr.msra.gmra.mrb[0].mxu0 %vm124_vm0, %v115_v9 }
  0x79   :  { %614 = vmatpush3.bf16.msra.mxu0 %v611_v10  ;;  %578 = vmatprep.mubr.msk.f32.mxu0 %vm124_vm0, %v112_v14 }
  0x7a   :  { %616 = vmatprep.subr.bf16.mxu0 %v615_v13  ;;  %626 = vmatpush3.bf16.msra.mxu1 %v623_v32 }
  0x7b   :  { %628 = vmatprep.subr.bf16.mxu1 %v627_v35 }
  0x7d   :  { %618 = vmatpush3.bf16.msra.mxu0 %v615_v13 }
  0x80   :  { %579 = vmatmul.mubr.msk.f32.vlgmr.msra.gmra.mrb[0].mxu0 %vm124_vm0, %v113_v15 }
  0xe1   :  { %v311_v36 = vpop.permute.xlu0 %310 }
  0xe5   :  { %v313_v40 = vpop.permute.xlu0 %312 }
 0x153   :  { %v580_v20 = vpop.f32.mrb[0].mxu0 }
 0x154   :  { %v295_v21 = vadd.f32 %v580_v20, %v527_v19  ;;  %v278_v22 = vpop.f32.mrb[1].mxu0 }
 0x155   :  { %v294_v23 = vadd.f32 %v527_v19, %v278_v22 }
 0x156   :  { %v529_v24 = vmul.f32 -1.442695, %v295_v21 }
 0x157   :  { %v528_v25 = vmul.f32 -1.442695, %v294_v23 }
 0x158   :  { %650 = vpow2.f32 %v529_v24 }
 0x159   :  { %652 = vpow2.f32 %v528_v25 }
 0x162   :  { %v651_v26 = vpop.eup %650 }
 0x163   :  { %v653_v27 = vpop.eup %652  ;;  %v303_v30 = vadd.f32 1.0, %v651_v26 }
 0x164   :  { %v302_v31 = vadd.f32 1.0, %v653_v27 }
 0x166   :  { %654 = vrcp.f32 %v302_v31 }
 0x167   :  { %656 = vrcp.f32 %v303_v30 }
 0x170   :  { %v655_v37 = vpop.eup %654 }
 0x171   :  { %v316_v38 = vmul.f32 %v655_v37, %v311_v36  ;;  %v657_v39 = vpop.eup %656  ;;  %v308_v47 = vmul.f32 %v655_v37, %v112_v14 }
 0x172   :  { %v317_v41 = vmul.f32 %v657_v39, %v313_v40  ;;  %v309_v48 = vmul.f32 %v657_v39, %v113_v15 }
 0x173   :  { %328 = vrot.lane.b32.xlu1 %v316_v38, %s831_s4 }
 0x177   :  { %330 = vrot.lane.b32.xlu1 %v317_v41, %s831_s4 }
 0x1e5   :  { %v329_v42 = vpop.permute.xlu1 %328 }
 0x1e6   :  { %589 = vmatprep.mubr.msk.f32.mxu1 %vm124_vm0, %v329_v42 }
 0x1e9   :  { %v331_v46 = vpop.permute.xlu1 %330 }
 0x1ea   :  { %590 = vmatmul.mubr.msk.f32.vlgmr.msra.gmra.mrb[0].mxu1 %vm124_vm0, %v331_v46 }
 0x1eb   :  { %630 = vmatpush3.bf16.msra.mxu1 %v627_v35  ;;  %600 = vmatprep.mubr.msk.f32.mxu1 %vm124_vm0, %v308_v47 }
 0x1ec   :  { %632 = vmatprep.subr.bf16.mxu1 %v631_v45 }
 0x1ef   :  { %634 = vmatpush3.bf16.msra.mxu1 %v631_v45 }
 0x1f2   :  { %601 = vmatmul.mubr.msk.f32.vlgmr.msra.gmra.mrb[0].mxu1 %vm124_vm0, %v309_v48 }
 0x2c5   :  { %v602_v50 = vpop.f32.mrb[0].mxu1 }
 0x2c6   :  { %v500_v51 = vadd.f32 %v602_v50, %v534_v49  ;;  %v483_v52 = vpop.f32.mrb[1].mxu1 }
 0x2c7   :  { %v499_v53 = vadd.f32 %v534_v49, %v483_v52 }
 0x2c8   :  { %502 = vst.msk [vmem:[#allocation13 + $0x8] sm:$0xff] %vm124_vm0, %v500_v51 }
 0x2c9   :  { %501 = vst.msk [vmem:[#allocation13] sm:$0xff] %vm124_vm0, %v499_v53 }
 0x2ca   :  { %801 = shalt.err (!%p798_p10)
}
 0x2cb   :  { %s802_s20 = scalar_lea.hbm %s1028_s8, 256 }
 0x2cc   :  { %p803_p11 = scmp.ne.s32.totalorder %s1028_s8, %s802_s20  ;;  %p806_p12 = scmp.lt.u32.totalorder %s802_s20, %s1028_s8 }
 0x2ce   :  { %p808_p13 = pnand %p806_p12, %p803_p11 }
 0x2d0   :  { %811 = shalt.err (!%p808_p13)
}
 0x2d1   :  { %514 = dma.vmem_to_hbm [thread:$0]  %s509_s15, 256, %s1028_s8, [#allocation4], %s824_s17, %s824_s17, %s825_s18  }
 0x2d2   :  { %820 = dma.done.wait [#allocation4], 256  }
 0x2d3   :  { %821 = vsyncadd [#allocation4], 4294967040 }
 0x2d4   :  { %518 = vsyncpa [#allocation3], 1 }
 0x2d5   :  { %519 = vsyncpa [#allocation6], 1 }
 0x2d6   :  { %520 = vsyncpa [#allocation9], 1 }
 0x2d7   :  { %521 = vsyncpa [#allocation12], 1 }
 0x2d8   :  { %522 = vsyncpa [#allocation4], 1 }

</bundles_post_ra>
